<compile_context>
chip_gen: v7x
topology: tpu7x:2x2x1
jax: 0.10.0
libtpu: 0.0.40
codegen_flags: <defaults>
</compile_context>

<pallas_src>
import functools

import jax
import jax.numpy as jnp
from jax.experimental import pallas as pl
from jax.experimental.pallas import tpu as pltpu


def _round_up(x: int, m: int) -> int:
    return ((x + m - 1) // m) * m


def linear_relu_kernel(x_ref, w_ref, b_ref, o_ref):
    # x_ref : (tm, K)   f32  VMEM   activation tile (streams; re-DMA'd only when i changes)
    # w_ref : (K, Fp)   bf16 VMEM   full weight, resident (loaded once)
    # b_ref : (1, Fp)   f32  VMEM   full bias, resident (loaded once)
    # o_ref : (tm, tn)  f32  VMEM   output tile
    j = pl.program_id(1)
    tn = o_ref.shape[1]
    col = pl.multiple_of(j * tn, 128)          # lane-aligned dynamic slice start

    x_bf = x_ref[...].astype(jnp.bfloat16)     # cast on VPU, hidden under DMA
    w_tile = w_ref[:, pl.ds(col, tn)]          # (K, tn) slice of resident weight

    y = jnp.dot(x_bf, w_tile, preferred_element_type=jnp.float32)
    y = y + b_ref[:, pl.ds(col, tn)]           # bias broadcast over rows (f32)
    o_ref[...] = jnp.maximum(y, 0.0).astype(o_ref.dtype)


def prepare_params(weight, bias):
    """One-time parameter prep (amortized across forward calls).

    weight: (F, K) f32  ->  (K, Fp) bf16, lane-dense, Fp = round_up(F, 128)
    bias  : (F,)   f32  ->  (1, Fp) f32
    """
    F, _K = weight.shape
    Fp = _round_up(F, 128)
    w_t = weight.T.astype(jnp.bfloat16)                    # (K, F)
    if Fp != F:
        w_t = jnp.pad(w_t, ((0, 0), (0, Fp - F)))
    b2 = bias.astype(jnp.float32)
    if Fp != F:
        b2 = jnp.pad(b2, (0, Fp - F))
    return w_t, b2.reshape(1, Fp)


@functools.partial(jax.jit, static_argnames=("feature_dim", "tm", "tn"))
def source_model_forward(x, w_t, bias2, *, feature_dim, tm=512, tn=512):
    """relu(x @ weight.T + bias) with a tiled Pallas TPU kernel.

    x: (B, K) f32;  w_t: (K, Fp) bf16;  bias2: (1, Fp) f32.
    """
    B, K = x.shape
    Kw, Fp = w_t.shape
    assert Kw == K and bias2.shape == (1, Fp)

    # Tile sizes: sublane/lane aligned, clamped to the (padded) problem size.
    tm = min(tm, _round_up(B, 8))      # batch tile, multiple of 8 sublanes
    tn = min(tn, Fp)                   # feature tile, multiple of 128 lanes

    grid = (pl.cdiv(B, tm), Fp // tn)  # ragged last batch block handled by Pallas

    itemsize = x.dtype.itemsize
    cost = pl.CostEstimate(
        flops=2 * B * K * Fp,
        transcendentals=0,
        bytes_accessed=(B * K * itemsize          # x read once
                        + K * Fp * 2              # weight read once (resident)
                        + Fp * 4                  # bias read once
                        + B * Fp * 4),            # output written once
    )

    out = pl.pallas_call(
        linear_relu_kernel,
        out_shape=jax.ShapeDtypeStruct((B, Fp), x.dtype),
        grid_spec=pltpu.PrefetchScalarGridSpec(
            num_scalar_prefetch=0,
            grid=grid,
            in_specs=[
                # x tile: index constant across j -> DMA only when i changes.
                pl.BlockSpec((tm, K), lambda i, j: (i, 0)),
                # Full weight, resident: DMA'd exactly once.
                pl.BlockSpec((K, Fp), lambda i, j: (0, 0)),
                # Full bias, resident: DMA'd exactly once.
                pl.BlockSpec((1, Fp), lambda i, j: (0, 0)),
            ],
            out_specs=pl.BlockSpec((tm, tn), lambda i, j: (i, j)),
        ),
        compiler_params=pltpu.CompilerParams(
            dimension_semantics=("parallel", "parallel"),
        ),
        cost_estimate=cost,
    )(x, w_t, bias2)

    return out[:, :feature_dim]


if __name__ == "__main__":
    # Small shapes consistent with the module: batch=8, input_dim=32, feature_dim=128
    B, INPUT_DIM, FEATURE_DIM = 8, 32, 128

    key = jax.random.PRNGKey(0)
    kx, kw, kb = jax.random.split(key, 3)

    # Deterministic parameter init (mimic nn.Linear default: U(-1/sqrt(in), 1/sqrt(in)))
    bound = 1.0 / jnp.sqrt(jnp.float32(INPUT_DIM))
    weight = jax.random.uniform(kw, (FEATURE_DIM, INPUT_DIM), jnp.float32, -bound, bound)
    bias = jax.random.uniform(kb, (FEATURE_DIM,), jnp.float32, -bound, bound)

    x = jax.random.normal(kx, (B, INPUT_DIM), jnp.float32)

    # One-time parameter prep (transpose + pad + bf16 cast), outside the hot path.
    w_t, bias2 = prepare_params(weight, bias)
    w_t = jax.block_until_ready(w_t)
    bias2 = jax.block_until_ready(bias2)

    out = source_model_forward(x, w_t, bias2, feature_dim=FEATURE_DIM)
    out = jax.block_until_ready(out)

    # Reference checks (pure JAX).
    ref_f32 = jnp.maximum(x @ weight.T + bias, 0.0)
    ref_bf16 = jnp.maximum(
        jnp.dot(
            x.astype(jnp.bfloat16),
            weight.T.astype(jnp.bfloat16),
            preferred_element_type=jnp.float32,
        )
        + bias,
        0.0,
    ).astype(x.dtype)

    assert out.shape == (B, FEATURE_DIM)
    # Tight match against the bf16-operand reference; loose vs. full f32.
    assert jnp.allclose(out, ref_bf16, atol=1e-5, rtol=1e-5)
    assert jnp.allclose(out, ref_f32, atol=2e-2, rtol=2e-2)

    print("KERNEL_OK")
</pallas_src>

<mosaic_0001>
module attributes {stable_mosaic.version = 11 : i64} {
  func.func @linear_relu_kernel(%arg0: i32, %arg1: i32, %arg2: memref<8x32xf32, #tpu.memory_space<vmem>>, %arg3: memref<32x128xbf16, #tpu.memory_space<vmem>>, %arg4: memref<1x128xf32, #tpu.memory_space<vmem>>, %arg5: memref<8x128xf32, #tpu.memory_space<vmem>>) attributes {dimension_semantics = [#tpu.dimension_semantics<parallel>, #tpu.dimension_semantics<parallel>], iteration_bounds = array<i64: 1, 1>, scalar_prefetch = 0 : i64, scratch_operands = 0 : i64, tpu.core_type = #tpu.core_type<tc>, window_params = [{transform_indices = @transform_0, window_bounds = array<i64: 8, 32>}, {pipeline_mode = #tpu.pipeline_mode<synchronous>, transform_indices = @transform_1, window_bounds = array<i64: 32, 128>}, {pipeline_mode = #tpu.pipeline_mode<synchronous>, transform_indices = @transform_2, window_bounds = array<i64: 1, 128>}, {transform_indices = @transform_3, window_bounds = array<i64: 8, 128>}]} {
    %c128_i32 = arith.constant 128 : i32
    %0 = arith.muli %arg1, %c128_i32 : i32
    %1 = tpu.assume_multiple %0, 128 : i32
    %c0 = arith.constant 0 : index
    %c0_0 = arith.constant 0 : index
    %2 = vector.load %arg2[%c0, %c0_0] : memref<8x32xf32, #tpu.memory_space<vmem>>, vector<8x32xf32>
    %3 = arith.truncf %2 : vector<8x32xf32> to vector<8x32xbf16>
    %c0_1 = arith.constant 0 : index
    %4 = arith.index_cast %1 : i32 to index
    %5 = vector.load %arg3[%c0_1, %4] : memref<32x128xbf16, #tpu.memory_space<vmem>>, vector<32x128xbf16>
    %cst = arith.constant dense<0.000000e+00> : vector<8x128xf32>
    %6 = tpu.matmul %3, %5, %cst {dimension_numbers = #tpu.dot_dimension_numbers<[1], [0], [0], [1], [0, 0, 1, 1], [], []>} : vector<8x32xbf16>, vector<32x128xbf16>, vector<8x128xf32> -> vector<8x128xf32>
    %c0_2 = arith.constant 0 : index
    %7 = arith.index_cast %1 : i32 to index
    %8 = vector.load %arg4[%c0_2, %7] : memref<1x128xf32, #tpu.memory_space<vmem>>, vector<1x128xf32>
    %9 = vector.broadcast %8 : vector<1x128xf32> to vector<8x128xf32>
    %10 = arith.addf %6, %9 : vector<8x128xf32>
    %cst_3 = arith.constant 0.000000e+00 : f32
    %11 = vector.broadcast %cst_3 : f32 to vector<8x128xf32>
    %12 = arith.maximumf %10, %11 : vector<8x128xf32>
    %c0_4 = arith.constant 0 : index
    %c0_5 = arith.constant 0 : index
    %13 = vector.load %arg5[%c0_4, %c0_5] : memref<8x128xf32, #tpu.memory_space<vmem>>, vector<8x128xf32>
    tpu.vector_store %arg5[%c0_4, %c0_5], %12 {strides = array<i32>} : memref<8x128xf32, #tpu.memory_space<vmem>>, vector<8x128xf32>,
    return
  }
  func.func @transform_0(%arg0: i32, %arg1: i32) -> (i32, i32) {
    %c0_i32 = arith.constant 0 : i32
    %c0_i32_0 = arith.constant 0 : i32
    return %arg0, %c0_i32 : i32, i32
  }
  func.func @transform_1(%arg0: i32, %arg1: i32) -> (i32, i32) {
    %c0_i32 = arith.constant 0 : i32
    %c0_i32_0 = arith.constant 0 : i32
    %c0_i32_1 = arith.constant 0 : i32
    return %c0_i32, %c0_i32_0 : i32, i32
  }
  func.func @transform_2(%arg0: i32, %arg1: i32) -> (i32, i32) {
    %c0_i32 = arith.constant 0 : i32
    %c0_i32_0 = arith.constant 0 : i32
    %c0_i32_1 = arith.constant 0 : i32
    return %c0_i32, %c0_i32_0 : i32, i32
  }
  func.func @transform_3(%arg0: i32, %arg1: i32) -> (i32, i32) {
    %c0_i32 = arith.constant 0 : i32
    return %arg0, %arg1 : i32, i32
  }
}

</mosaic_0001>

<bundles_post_ra>
// kernel: source_model_forward.1
= control target key start
LH: loop header
LB: loop body
LE: loop exit
PB: predicated region body
PF: predicated region fallthrough
CT: control target
= control target key end

     0   :  { %8 = vsyncpa [#allocation3], 0  ;;  %s307_s0 = inlined_call_operand.hbm [shape: f32[8,32], index: 0, kind: input, shape index: {}]   ;;  %s308_s1 = inlined_call_operand.hbm [shape: bf16[32,128], index: 1, kind: input, shape index: {}]   ;;  %s309_s2 = inlined_call_operand.vmem [shape: f32[1,128], index: 2, kind: input, shape index: {}]   ;;  %s310_s3 = inlined_call_operand.hbm [shape: f32[8,128], index: 3, kind: output, shape index: {}]  }
   0x1   :  { %9 = vsyncpa [#allocation6], 0 }
   0x2   :  { %10 = vsyncpa [#allocation4], 0  ;;  %s234_s12 = smov [#allocation2]   ;;  %s235_s14 = smov [#allocation5]  }
   0x3   :  { %s17_s13 = sshll.u32 %s234_s12, 4  ;;  %s26_s15 = sshll.u32 %s235_s14, 4  ;;  %s18_s13 = int_to_ptr.vmem [resolvable:$true] %s17_s13  ;;  %s261_s15 = int_to_ptr.vmem [resolvable:$true] %s26_s15 }
   0x4   :  { %s162_s18 = scalar_lea.hbm %s307_s0, 128 }
   0x5   :  { %p163_p0 = scmp.ne.s32.totalorder %s307_s0, %s162_s18  ;;  %p166_p1 = scmp.lt.u32.totalorder %s162_s18, %s307_s0 }
   0x7   :  { %p168_p2 = pnand %p166_p1, %p163_p0 }
   0x9   :  { %171 = shalt.err (!%p168_p2)
}
   0xa   :  { %s172_s23 = scalar_lea.vmem %s18_s13, 128  ;;  %p177_p4 = scmp.lt.s32.totalorder %s18_s13, %s18_s13 }
   0xb   :  { %p173_p3 = scmp.ne.s32.totalorder %s18_s13, %s172_s23  ;;  %p178_p5 = scmp.lt.s32.totalorder %s172_s23, %s172_s23 }
   0xd   :  { %p179_p6 = por %p178_p5, %p177_p4 }
   0xf   :  { %p180_p7 = pnand %p179_p6, %p173_p3 }
  0x11   :  { %183 = shalt.err (!%p180_p7)
}
  0x12   :  { %20 = dma.hbm_to_vmem [thread:$0]  %s307_s0, 128, %s18_s13, [#allocation3]  }
  0x13   :  { %s184_s28 = scalar_lea.hbm %s308_s1, 256 }
  0x14   :  { %p185_p8 = scmp.ne.s32.totalorder %s308_s1, %s184_s28  ;;  %p188_p9 = scmp.lt.u32.totalorder %s184_s28, %s308_s1 }
  0x16   :  { %p190_p10 = pnand %p188_p9, %p185_p8 }
  0x18   :  { %193 = shalt.err (!%p190_p10)
}
  0x19   :  { %s194_s6 = scalar_lea.vmem %s261_s15, 256  ;;  %p199_p12 = scmp.lt.s32.totalorder %s261_s15, %s261_s15 }
  0x1a   :  { %p195_p11 = scmp.ne.s32.totalorder %s261_s15, %s194_s6  ;;  %p200_p13 = scmp.lt.s32.totalorder %s194_s6, %s194_s6 }
  0x1c   :  { %p201_p0 = por %p200_p13, %p199_p12 }
  0x1e   :  { %p202_p1 = pnand %p201_p0, %p195_p11 }
  0x20   :  { %205 = shalt.err (!%p202_p1)
}
  0x21   :  { %s236_s0 = smov 64   ;;  %s237_s7 = smov 4  }
  0x22   :  { %32 = dma.hbm_to_vmem [thread:$0]  %s308_s1, 256, %s261_s15, [#allocation6], %s236_s0, %s236_s0, %s237_s7  }
  0x23   :  { %228 = dma.done.wait [#allocation3], 128  }
  0x24   :  { %229 = vsyncadd [#allocation3], 4294967168 }
  0x25   :  { %230 = dma.done.wait [#allocation6], 256  }
  0x26   :  { %231 = vsyncadd [#allocation6], 4294967040  ;;  %v238_v0 = vmov 0.0   ;;  %vm239_vm0 = vmmov 0   ;;  %v160_v1 = vld [vmem:[#allocation5] sm:$0xff]   ;;  %v161_v2 = vld [vmem:[#allocation5 + $0x8] sm:$0xff]  }
  0x27   :  { %145 = vmatprep.subr.bf16.mxu0 %v238_v0  ;;  %149 = vmatprep.mubr.msk.bf16.mxu0 %vm239_vm0, %v238_v0  ;;  %v43_v3 = vld [vmem:[#allocation2] sm:$0xff]  ;;  %vm73_vm1 = vcmask 261120   ;;  %s240_s1 = smov [#allocation7]  }
  0x28   :  { %146 = vmatpush3.bf16.msra.mxu0 %v160_v1  ;;  %v44_v4 = vpack.c.bf16 %v43_v3, %v43_v3  ;;  %v138_v5 = vld [vmem:[%s309_s2] ss:$0 sm:$0xff]  ;;  %s125_s12 = sshll.u32 %s240_s1, 4  ;;  %s126_s12 = int_to_ptr.vmem [resolvable:$true] %s125_s12 }
  0x29   :  { %147 = vmatprep.subr.bf16.mxu0 %v238_v0  ;;  %s206_s13 = scalar_lea.vmem %s126_s12, 128  ;;  %p211_p3 = scmp.lt.s32.totalorder %s126_s12, %s126_s12 }
  0x2a   :  { %p207_p2 = scmp.ne.s32.totalorder %s126_s12, %s206_s13  ;;  %p212_p4 = scmp.lt.s32.totalorder %s206_s13, %s206_s13 }
  0x2c   :  { %148 = vmatpush3.bf16.msra.mxu0 %v161_v2  ;;  %p213_p5 = por %p212_p4, %p211_p3 }
  0x2e   :  { %p214_p6 = pnand %p213_p5, %p207_p2 }
  0x2f   :  { %150 = vmatmul.mubr.msk.bf16.vlgmr.msra.gmra.mrb[0].mxu0 %vm73_vm1, %v44_v4 }
 0x102   :  { %v111_v6 = vpop.f32.mrb[0].mxu0 }
 0x103   :  { %v112_v7 = vadd.f32 %v138_v5, %v111_v6  ;;  %v151_v8 = vpop.f32.mrb[1].mxu0 }
 0x104   :  { %v114_v9 = vpop.f32.mrb[2].mxu0 }
 0x105   :  { %v117_v10 = vmax.f32 %v112_v7, 0.0  ;;  %v152_v11 = vpop.f32.mrb[3].mxu0 }
 0x107   :  { %118 = vst [vmem:[#allocation7] sm:$0xff] %v117_v10 }
 0x108   :  { %217 = shalt.err (!%p214_p6)
}
 0x109   :  { %s218_s2 = scalar_lea.hbm %s310_s3, 128 }
 0x10a   :  { %p219_p7 = scmp.ne.s32.totalorder %s310_s3, %s218_s2  ;;  %p222_p8 = scmp.lt.u32.totalorder %s218_s2, %s310_s3 }
 0x10c   :  { %p224_p9 = pnand %p222_p8, %p219_p7 }
 0x10e   :  { %227 = shalt.err (!%p224_p9)
}
 0x10f   :  { %128 = dma.vmem_to_hbm [thread:$0]  %s126_s12, 128, %s310_s3, [#allocation4]  }
 0x110   :  { %232 = dma.done.wait [#allocation4], 128  }
 0x111   :  { %233 = vsyncadd [#allocation4], 4294967168 }
 0x112   :  { %132 = vsyncpa [#allocation3], 1 }
 0x113   :  { %133 = vsyncpa [#allocation6], 1 }
 0x114   :  { %134 = vsyncpa [#allocation4], 1 }

</bundles_post_ra>
